<compile_context>
chip_gen: v7x
topology: tpu7x:2x2x1
jax: 0.10.0
libtpu: 0.0.40
codegen_flags: <defaults>
</compile_context>

<pallas_src>
import math

import jax
import jax.numpy as jnp
from jax.experimental import pallas as pl
from jax.experimental.pallas import tpu as pltpu

_INV_SQRT2 = 1.0 / math.sqrt(2.0)


def _ff_kernel(x_ref, w1_ref, b1_ref, w2_ref, b2_ref, o_ref, acc_ref):
    """One (batch-tile, hidden-chunk) grid step of the fused FFN."""
    hk = pl.program_id(1)

    @pl.when(hk == 0)
    def _init():
        acc_ref[...] = jnp.zeros_like(acc_ref)

    # First matmul: native-dtype operands into the MXU, f32 accumulation.
    h = jnp.dot(x_ref[...], w1_ref[...], preferred_element_type=jnp.float32)
    h = h + b1_ref[...].astype(jnp.float32)

    # Exact erf-based GELU (matches PyTorch nn.GELU() default), f32 math.
    h = 0.5 * h * (1.0 + jax.lax.erf(h * _INV_SQRT2))

    # Second matmul: partial product over this hidden chunk -> f32 accumulator.
    acc_ref[...] += jnp.dot(h.astype(w2_ref.dtype), w2_ref[...],
                            preferred_element_type=jnp.float32)

    @pl.when(hk == pl.num_programs(1) - 1)
    def _finalize():
        o_ref[...] = (acc_ref[...] + b2_ref[...].astype(jnp.float32)).astype(o_ref.dtype)


def _round_up(v, m):
    return (v + m - 1) // m * m


def nonlinear_feed_forward(x, w1, b1, w2, b2, *, tm=None, th=None):
    """Fused y = GELU(x @ w1 + b1) @ w2 + b2.

    x : [B, input_dim]; w1 : [input_dim, hidden]; b1 : [hidden];
    w2 : [hidden, output]; b2 : [output].
    (PyTorch nn.Linear stores weight as [out, in]; pass it transposed.)
    """
    B, K = x.shape
    Kw, H = w1.shape
    Hw, N = w2.shape
    assert Kw == K and Hw == H and b1.shape == (H,) and b2.shape == (N,)

    # ---- lane-dense padding: feature dims -> multiples of 128 ----------------
    K_pad = _round_up(K, 128)
    H_pad = _round_up(H, 128)
    N_pad = _round_up(N, 128)

    # ---- batch tile: real tile so the grid has >1 step and DMA overlaps ------
    if tm is None:
        tm = min(256, _round_up(B, 8))
    tm = _round_up(int(tm), 8)
    B_pad = _round_up(B, tm)

    # ---- hidden-dim chunk so W1/W2 stream instead of being fully resident ----
    if th is None:
        for cand in (512, 256, 128):
            if H_pad % cand == 0:
                th = cand
                break
    th = int(th)
    assert th % 128 == 0 and H_pad % th == 0

    n_b = B_pad // tm
    n_h = H_pad // th

    # ---- zero-pad operands (zeros are exact no-ops through matmul/GELU) ------
    x_p = jnp.pad(x, ((0, B_pad - B), (0, K_pad - K)))
    w1_p = jnp.pad(w1, ((0, K_pad - K), (0, H_pad - H)))
    w2_p = jnp.pad(w2, ((0, H_pad - H), (0, N_pad - N)))
    b1_p = jnp.pad(b1, (0, H_pad - H)).reshape(1, H_pad)
    b2_p = jnp.pad(b2, (0, N_pad - N)).reshape(1, N_pad)

    # Single-buffer blocks whose index never changes (resident, never re-fetched);
    # keep double buffering for slabs that stream along the hidden axis.
    w_mode = pl.Buffered(1) if n_h == 1 else pl.Buffered(2)
    const_mode = pl.Buffered(1)

    # ---- VMEM budget / compiler hints (sized to fit v7x's 64 MiB) ------------
    w_bufs = 1 if n_h == 1 else 2
    isz = lambda a: a.dtype.itemsize
    vmem_bytes = (
        2 * tm * K_pad * isz(x_p)            # x tile, double buffered
        + w_bufs * K_pad * th * isz(w1_p)    # W1 slab(s)
        + w_bufs * th * N_pad * isz(w2_p)    # W2 slab(s)
        + w_bufs * 8 * th * isz(b1_p)        # b1 (sublane-padded)
        + 8 * N_pad * isz(b2_p)              # b2
        + 2 * tm * N_pad * isz(x_p)          # out tile, double buffered
        + tm * N_pad * 4                     # f32 accumulator scratch
        + 2 * tm * th * 4                    # live f32 activations
    )
    vmem_limit = min(int(vmem_bytes * 1.5) + (4 << 20), 64 << 20)

    cost = pl.CostEstimate(
        flops=int(2 * B_pad * (K_pad * H_pad + H_pad * N_pad)),
        transcendentals=int(B_pad * H_pad),
        bytes_accessed=int(
            x_p.size * isz(x_p) + w1_p.size * isz(w1_p) + w2_p.size * isz(w2_p)
            + b1_p.size * isz(b1_p) + b2_p.size * isz(b2_p)
            + B_pad * N_pad * isz(x_p)),
    )

    out = pl.pallas_call(
        _ff_kernel,
        out_shape=jax.ShapeDtypeStruct((B_pad, N_pad), x.dtype),
        grid_spec=pltpu.PrefetchScalarGridSpec(
            num_scalar_prefetch=0,
            grid=(n_b, n_h),
            in_specs=[
                pl.BlockSpec((tm, K_pad), lambda i, hk: (i, 0)),
                pl.BlockSpec((K_pad, th), lambda i, hk: (0, hk), pipeline_mode=w_mode),
                pl.BlockSpec((1, th), lambda i, hk: (0, hk), pipeline_mode=w_mode),
                pl.BlockSpec((th, N_pad), lambda i, hk: (hk, 0), pipeline_mode=w_mode),
                pl.BlockSpec((1, N_pad), lambda i, hk: (0, 0), pipeline_mode=const_mode),
            ],
            out_specs=pl.BlockSpec((tm, N_pad), lambda i, hk: (i, 0)),
            scratch_shapes=[pltpu.VMEM((tm, N_pad), jnp.float32)],
        ),
        compiler_params=pltpu.CompilerParams(
            dimension_semantics=("parallel", "arbitrary"),
            vmem_limit_bytes=vmem_limit,
        ),
        cost_estimate=cost,
    )(x_p, w1_p, b1_p, w2_p, b2_p)

    return out[:B, :N]


def _reference(x, w1, b1, w2, b2):
    # High-precision reference (explicit HIGHEST so the jnp path doesn't use
    # reduced-precision MXU passes).
    h = jnp.dot(x, w1, precision=jax.lax.Precision.HIGHEST) + b1
    h = 0.5 * h * (1.0 + jax.lax.erf(h * _INV_SQRT2))
    return jnp.dot(h, w2, precision=jax.lax.Precision.HIGHEST) + b2


if __name__ == "__main__":
    # Small shapes consistent with the module's forward: x [batch, input_dim].
    batch, input_dim, hidden_dim, output_dim = 256, 16, 32, 8

    key = jax.random.PRNGKey(0)
    kx, kw1, kb1, kw2, kb2 = jax.random.split(key, 5)

    x = jax.random.normal(kx, (batch, input_dim), dtype=jnp.float32)

    # Deterministic init mimicking nn.Linear's U(-1/sqrt(fan_in), 1/sqrt(fan_in)).
    lim1 = 1.0 / math.sqrt(input_dim)
    w1 = jax.random.uniform(kw1, (input_dim, hidden_dim), jnp.float32, -lim1, lim1)
    b1 = jax.random.uniform(kb1, (hidden_dim,), jnp.float32, -lim1, lim1)
    lim2 = 1.0 / math.sqrt(hidden_dim)
    w2 = jax.random.uniform(kw2, (hidden_dim, output_dim), jnp.float32, -lim2, lim2)
    b2 = jax.random.uniform(kb2, (output_dim,), jnp.float32, -lim2, lim2)

    # tm=64 -> grid (4, 1): batch axis actually pipelines / shards across cores.
    out = nonlinear_feed_forward(x, w1, b1, w2, b2, tm=64)
    out = jax.block_until_ready(out)

    ref = _reference(x, w1, b1, w2, b2)
    assert out.shape == (batch, output_dim)
    # Loose-ish tolerance: MXU f32 matmuls at default precision may use bf16
    # passes, while the reference uses HIGHEST precision.
    assert jnp.allclose(out, ref, atol=2e-2, rtol=2e-2), float(jnp.max(jnp.abs(out - ref)))

    print("KERNEL_OK")
</pallas_src>

<mosaic_0001>
module attributes {stable_mosaic.version = 11 : i64} {
  func.func @_ff_kernel(%arg0: i32, %arg1: i32, %arg2: memref<64x128xf32, #tpu.memory_space<vmem>>, %arg3: memref<128x128xf32, #tpu.memory_space<vmem>>, %arg4: memref<1x128xf32, #tpu.memory_space<vmem>>, %arg5: memref<128x128xf32, #tpu.memory_space<vmem>>, %arg6: memref<1x128xf32, #tpu.memory_space<vmem>>, %arg7: memref<64x128xf32, #tpu.memory_space<vmem>>, %arg8: memref<64x128xf32, #tpu.memory_space<vmem>>) attributes {dimension_semantics = [#tpu.dimension_semantics<parallel>, #tpu.dimension_semantics<arbitrary>], iteration_bounds = array<i64: 4, 1>, scalar_prefetch = 0 : i64, scratch_operands = 1 : i64, tpu.core_type = #tpu.core_type<tc>, window_params = [{transform_indices = @transform_0, window_bounds = array<i64: 64, 128>}, {pipeline_mode = #tpu.pipeline_mode<synchronous>, transform_indices = @transform_1, window_bounds = array<i64: 128, 128>}, {pipeline_mode = #tpu.pipeline_mode<synchronous>, transform_indices = @transform_2, window_bounds = array<i64: 1, 128>}, {pipeline_mode = #tpu.pipeline_mode<synchronous>, transform_indices = @transform_3, window_bounds = array<i64: 128, 128>}, {pipeline_mode = #tpu.pipeline_mode<synchronous>, transform_indices = @transform_4, window_bounds = array<i64: 1, 128>}, {transform_indices = @transform_5, window_bounds = array<i64: 64, 128>}]} {
    %c0_i32 = arith.constant 0 : i32
    %0 = arith.cmpi eq, %arg1, %c0_i32 : i32
    %1 = arith.extui %0 : i1 to i32
    %c0_i32_0 = arith.constant 0 : i32
    %2 = arith.cmpi ne, %1, %c0_i32_0 : i32
    scf.if %2 {
      %cst_18 = arith.constant 0.000000e+00 : f32
      %25 = vector.broadcast %cst_18 : f32 to vector<64x128xf32>
      %c0_19 = arith.constant 0 : index
      %c0_20 = arith.constant 0 : index
      %26 = vector.load %arg8[%c0_19, %c0_20] : memref<64x128xf32, #tpu.memory_space<vmem>>, vector<64x128xf32>
      tpu.vector_store %arg8[%c0_19, %c0_20], %25 {strides = array<i32>} : memref<64x128xf32, #tpu.memory_space<vmem>>, vector<64x128xf32>,
    } else {
    }
    %c0 = arith.constant 0 : index
    %c0_1 = arith.constant 0 : index
    %3 = vector.load %arg2[%c0, %c0_1] : memref<64x128xf32, #tpu.memory_space<vmem>>, vector<64x128xf32>
    %c0_2 = arith.constant 0 : index
    %c0_3 = arith.constant 0 : index
    %4 = vector.load %arg3[%c0_2, %c0_3] : memref<128x128xf32, #tpu.memory_space<vmem>>, vector<128x128xf32>
    %cst = arith.constant dense<0.000000e+00> : vector<64x128xf32>
    %5 = tpu.matmul %3, %4, %cst {dimension_numbers = #tpu.dot_dimension_numbers<[1], [0], [0], [1], [0, 0, 1, 1], [], []>} : vector<64x128xf32>, vector<128x128xf32>, vector<64x128xf32> -> vector<64x128xf32>
    %c0_4 = arith.constant 0 : index
    %c0_5 = arith.constant 0 : index
    %6 = vector.load %arg4[%c0_4, %c0_5] : memref<1x128xf32, #tpu.memory_space<vmem>>, vector<1x128xf32>
    %7 = vector.broadcast %6 : vector<1x128xf32> to vector<64x128xf32>
    %8 = arith.addf %5, %7 : vector<64x128xf32>
    %cst_6 = arith.constant 5.000000e-01 : f32
    %9 = vector.broadcast %cst_6 : f32 to vector<64x128xf32>
    %10 = arith.mulf %9, %8 : vector<64x128xf32>
    %cst_7 = arith.constant 0.707106769 : f32
    %11 = vector.broadcast %cst_7 : f32 to vector<64x128xf32>
    %12 = arith.mulf %8, %11 : vector<64x128xf32>
    %13 = math.erf %12 : vector<64x128xf32>
    %cst_8 = arith.constant 1.000000e+00 : f32
    %14 = vector.broadcast %cst_8 : f32 to vector<64x128xf32>
    %15 = arith.addf %14, %13 : vector<64x128xf32>
    %16 = arith.mulf %10, %15 : vector<64x128xf32>
    %c0_9 = arith.constant 0 : index
    %c0_10 = arith.constant 0 : index
    %17 = vector.load %arg8[%c0_9, %c0_10] : memref<64x128xf32, #tpu.memory_space<vmem>>, vector<64x128xf32>
    %c0_11 = arith.constant 0 : index
    %c0_12 = arith.constant 0 : index
    %18 = vector.load %arg5[%c0_11, %c0_12] : memref<128x128xf32, #tpu.memory_space<vmem>>, vector<128x128xf32>
    %cst_13 = arith.constant dense<0.000000e+00> : vector<64x128xf32>
    %19 = tpu.matmul %16, %18, %cst_13 {dimension_numbers = #tpu.dot_dimension_numbers<[1], [0], [0], [1], [0, 0, 1, 1], [], []>} : vector<64x128xf32>, vector<128x128xf32>, vector<64x128xf32> -> vector<64x128xf32>
    %20 = arith.addf %17, %19 : vector<64x128xf32>
    %c0_14 = arith.constant 0 : index
    %c0_15 = arith.constant 0 : index
    %21 = vector.load %arg8[%c0_14, %c0_15] : memref<64x128xf32, #tpu.memory_space<vmem>>, vector<64x128xf32>
    tpu.vector_store %arg8[%c0_14, %c0_15], %20 {strides = array<i32>} : memref<64x128xf32, #tpu.memory_space<vmem>>, vector<64x128xf32>,
    %c0_i32_16 = arith.constant 0 : i32
    %22 = arith.cmpi eq, %arg1, %c0_i32_16 : i32
    %23 = arith.extui %22 : i1 to i32
    %c0_i32_17 = arith.constant 0 : i32
    %24 = arith.cmpi ne, %23, %c0_i32_17 : i32
    scf.if %24 {
      %c0_18 = arith.constant 0 : index
      %c0_19 = arith.constant 0 : index
      %25 = vector.load %arg8[%c0_18, %c0_19] : memref<64x128xf32, #tpu.memory_space<vmem>>, vector<64x128xf32>
      %c0_20 = arith.constant 0 : index
      %c0_21 = arith.constant 0 : index
      %26 = vector.load %arg6[%c0_20, %c0_21] : memref<1x128xf32, #tpu.memory_space<vmem>>, vector<1x128xf32>
      %27 = vector.broadcast %26 : vector<1x128xf32> to vector<64x128xf32>
      %28 = arith.addf %25, %27 : vector<64x128xf32>
      %c0_22 = arith.constant 0 : index
      %c0_23 = arith.constant 0 : index
      %29 = vector.load %arg7[%c0_22, %c0_23] : memref<64x128xf32, #tpu.memory_space<vmem>>, vector<64x128xf32>
      tpu.vector_store %arg7[%c0_22, %c0_23], %28 {strides = array<i32>} : memref<64x128xf32, #tpu.memory_space<vmem>>, vector<64x128xf32>,
    } else {
    }
    return
  }
  func.func @transform_0(%arg0: i32, %arg1: i32) -> (i32, i32) {
    %c0_i32 = arith.constant 0 : i32
    %c0_i32_0 = arith.constant 0 : i32
    return %arg0, %c0_i32 : i32, i32
  }
  func.func @transform_1(%arg0: i32, %arg1: i32) -> (i32, i32) {
    %c0_i32 = arith.constant 0 : i32
    %c0_i32_0 = arith.constant 0 : i32
    return %c0_i32, %arg1 : i32, i32
  }
  func.func @transform_2(%arg0: i32, %arg1: i32) -> (i32, i32) {
    %c0_i32 = arith.constant 0 : i32
    %c0_i32_0 = arith.constant 0 : i32
    return %c0_i32, %arg1 : i32, i32
  }
  func.func @transform_3(%arg0: i32, %arg1: i32) -> (i32, i32) {
    %c0_i32 = arith.constant 0 : i32
    %c0_i32_0 = arith.constant 0 : i32
    return %arg1, %c0_i32 : i32, i32
  }
  func.func @transform_4(%arg0: i32, %arg1: i32) -> (i32, i32) {
    %c0_i32 = arith.constant 0 : i32
    %c0_i32_0 = arith.constant 0 : i32
    %c0_i32_1 = arith.constant 0 : i32
    return %c0_i32, %c0_i32_0 : i32, i32
  }
  func.func @transform_5(%arg0: i32, %arg1: i32) -> (i32, i32) {
    %c0_i32 = arith.constant 0 : i32
    %c0_i32_0 = arith.constant 0 : i32
    return %arg0, %c0_i32 : i32, i32
  }
}

</mosaic_0001>

<bundles_post_ra>
// kernel: tpu_custom_call.1
= control target key start
LH: loop header
LB: loop body
LE: loop exit
PB: predicated region body
PF: predicated region fallthrough
CT: control target
= control target key end

     0   :  { %10 = vsyncpa [#allocation4], 0  ;;  %s1627_s0 = inlined_call_operand.hbm [shape: f32[256,128], index: 0, kind: input, shape index: {}]   ;;  %s1628_s1 = inlined_call_operand.hbm [shape: f32[128,128], index: 1, kind: input, shape index: {}]   ;;  %s1629_s2 = inlined_call_operand.vmem [shape: f32[1,128], index: 2, kind: input, shape index: {}]   ;;  %s1630_s3 = inlined_call_operand.hbm [shape: f32[128,128], index: 3, kind: input, shape index: {}]   ;;  %s1631_s4 = inlined_call_operand.vmem [shape: f32[1,128], index: 4, kind: input, shape index: {}]   ;;  %s1632_s5 = inlined_call_operand.hbm [shape: f32[256,128], index: 5, kind: output, shape index: {}]  }
   0x1   :  { %12 = vsyncpa [#allocation4 + $0x1], 0 }
   0x2   :  { %13 = vsyncpa [#allocation7], 0 }
   0x3   :  { %14 = vsyncpa [#allocation5], 0 }
   0x4   :  { %16 = vsyncpa [#allocation5 + $0x1], 0  ;;  %s1352_s18 = smov 0   ;;  %s1354_s19 = smov 0  }
   0x5   :  { %s1356_s20 = smov 0   ;;  %s1358_s21 = smov 0  }
   0x6   :  { %s1360_s22 = smov 0   ;;  %s1362_s23 = smov 0  }
   0x7 LB: > { %s813_s24 = sadd.s32 4294967295, %s1312_s23   ;;  %s814_s25 = sadd.s32 4294967294, %s1312_s23   ;;  %s1312_s23 = sphi %s1362_s23, %s22_s23   ;;  %s1308_s22 = sphi %s1360_s22, %s1656_s22   ;;  %s1304_s21 = sphi %s1358_s21, %s1655_s21   ;;  %s1300_s20 = sphi %s1356_s20, %s1654_s20   ;;  %s1296_s19 = sphi %s1354_s19, %s1653_s19   ;;  %s1292_s18 = sphi %s1352_s18, %s1652_s18  }
   0x8   : > { %p54_p0 = scmp.ne.s32.totalorder %s1296_s19, %s1292_s18  ;;  %p1386_p1 = scmp.eq.s32.totalorder %s813_s24, 0 }
   0x9   : > { %p1390_p2 = scmp.eq.s32.totalorder %s813_s24, 3  ;;  %p183_p3 = scmp.eq.s32.totalorder %s814_s25, 3 }
   0xa   : > { %s1638_s26 = scalar_select %p1386_p1, 1, 0 }
   0xb   : > { %s1639_s27 = scalar_select %p1390_p2, 1, 0 }
   0xc   : > { %p1396_p4 = por %p1386_p1, %p54_p0  ;;  %p815_p5 = scmp.ge.s32.totalorder %s1312_s23, 1 }
   0xd   : > { %p1401_p6 = por %p183_p3, %p54_p0  ;;  %p190_p7 = scmp.lt.s32.totalorder %s1312_s23, 5 }
   0xe   : > { %s1640_s28 = scalar_select %p1396_p4, 1, 0 }
   0xf   : > { %s1641_s29 = scalar_select %p1401_p6, 1, 0 }
  0x10   : > { %p1406_p8 = pnand %p815_p5, %p190_p7  ;;  %s1314_s6 = smov [#allocation6]  }
  0x11   : > { %s204_s7 = sshll.u32 %s1314_s6, 4  ;;  %s1315_s9 = smov [#allocation8]   ;;  %s205_s7 = int_to_ptr.vmem [resolvable:$true] %s204_s7 }
  0x12   : > { %s1642_s30 = scalar_select %p1406_p8, 1, 0 }
  0x13   : > { %p1049_p9 = pneg %p1406_p8  ;;  %s226_s10 = sshll.u32 %s1315_s9, 4  ;;  %s1418_s10 = int_to_ptr.vmem [resolvable:$true] %s226_s10 }
  0x14   : > { %s1140_s13 = scalar_lea.hbm %s1628_s1, 2048 }
  0x15   : > { %p1414_p10 = pnand %p1049_p9, %p1386_p1  ;;  %p1141_p11 = scmp.ne.s32.totalorder %s1628_s1, %s1140_s13 }
  0x16   : > { %p1147_p3 = scmp.lt.u32.totalorder %s1140_s13, %s1628_s1 }
  0x17   : > { %p1142_p12 = pneg %p1414_p10 }
  0x19   : > { %p1143_p13 = pnand %p1142_p12, %p1141_p11 }
  0x1b   : > { %p1144_p0 = pneg %p1143_p13 }
  0x1d   : > { %p1149_p5 = pnand %p1147_p3, %p1144_p0 }
  0x1f   : > { %1152 = shalt.err (!%p1149_p5)
}
  0x20   : > { %s1153_s24 = scalar_lea.vmem %s205_s7, 2048  ;;  %p1161_p1 = scmp.lt.s32.totalorder %s205_s7, %s205_s7 }
  0x21   : > { %p1154_p7 = scmp.ne.s32.totalorder %s205_s7, %s1153_s24  ;;  %p1162_p4 = scmp.lt.s32.totalorder %s1153_s24, %s1153_s24 }
  0x23   : > { %p1156_p9 = pnand %p1154_p7, %p1142_p12  ;;  %p1163_p8 = por %p1162_p4, %p1161_p1 }
  0x25   : > { %p1157_p6 = pneg %p1156_p9 }
  0x27   : > { %p1164_p2 = pnand %p1163_p8, %p1157_p6 }
  0x29   : > { %1167 = shalt.err (!%p1164_p2)
}
  0x2a   : > { %s1637_s25 = smov 128   ;;  %s1317_s6 = smov 8  }
  0x2b   : > { %1052 = dma.hbm_to_vmem [thread:$0]  (!%p1414_p10), %s1628_s1, 2048, %s205_s7, [#allocation7], %s1637_s25, %s1637_s25, %s1317_s6  }
  0x2c   : > { %s1168_s14 = scalar_lea.hbm %s1630_s3, 2048 }
  0x2d   : > { %p1169_p1 = scmp.ne.s32.totalorder %s1630_s3, %s1168_s14  ;;  %p1175_p6 = scmp.lt.u32.totalorder %s1168_s14, %s1630_s3 }
  0x2f   : > { %p1171_p2 = pnand %p1169_p1, %p1142_p12 }
  0x31   : > { %p1172_p4 = pneg %p1171_p2 }
  0x33   : > { %p1177_p8 = pnand %p1175_p6, %p1172_p4 }
  0x35   : > { %1180 = shalt.err (!%p1177_p8)
}
  0x36   : > { %s1181_s7 = scalar_lea.vmem %s1418_s10, 2048  ;;  %p1189_p3 = scmp.lt.s32.totalorder %s1418_s10, %s1418_s10 }
  0x37   : > { %p1182_p11 = scmp.ne.s32.totalorder %s1418_s10, %s1181_s7  ;;  %p1190_p5 = scmp.lt.s32.totalorder %s1181_s7, %s1181_s7 }
  0x39   : > { %p1184_p13 = pnand %p1182_p11, %p1142_p12  ;;  %p1191_p7 = por %p1190_p5, %p1189_p3 }
  0x3b   : > { %p1185_p0 = pneg %p1184_p13 }
  0x3d   : > { %p1192_p9 = pnand %p1191_p7, %p1185_p0 }
  0x3f   : > { %1195 = shalt.err (!%p1192_p9)
}
  0x40   : > { %1055 = dma.hbm_to_vmem [thread:$0]  (!%p1414_p10), %s1630_s3, 2048, %s1418_s10, [#allocation7], %s1637_s25, %s1637_s25, %s1317_s6  }
  0x41   : > { %s34_s8 = sadd.s32 1, %s1308_s22  ;;  %s41_s12 = sadd.s32 1, %s1300_s20 }
  0x42   : > { %p36_p12 = scmp.ge.s32.totalorder %s34_s8, 4  ;;  %p48_p1 = scmp.ne.s32.totalorder %s1300_s20, %s1296_s19 }
  0x43   : > { %p49_p2 = scmp.eq.s32.totalorder %s1312_s23, 0  ;;  %p1066_p4 = scmp.lt.s32.totalorder %s1312_s23, 4 }
  0x44   : > { %s1658_s8 = smov (%p36_p12, %s34_s8), 0  ;;  %p1644_p8 = scmp.ne.s32.totalorder %s1639_s27, 0 }
  0x45   : > { %p50_p6 = por %p49_p2, %p48_p1  ;;  %s38_s14 = ssub.s32 %s1308_s22, %s1658_s8 }
  0x46   : > { %p1483_p11 = por %p1644_p8, %p48_p1  ;;  %s243_s15 = sand.u32 1, %s1300_s20  }
  0x47   : > { %p39_p13 = scmp.eq.s32.totalorder %s38_s14, 0  ;;  %s820_s10 = sshll.u32 %s243_s15, 6 }
  0x48   : > { %s835_s16 = sshll.u32 %s1308_s22, 10  ;;  %s247_s27 = scalar_lea.vmem [#allocation3], %s820_s10 }
  0x49   : > { %s1492_s17 = scalar_select %p39_p13, %s1300_s20, %s41_s12  }
  0x4a   : > { %s1497_s9 = scalar_lea.hbm %s1627_s0, %s835_s16  ;;  %s254_s11 = sshll.u32 %s247_s27, 4  ;;  %s1505_s11 = int_to_ptr.vmem [resolvable:$true] %s254_s11 }
  0x4b   : > { %p1501_p10 = pnand %p1066_p4, %p50_p6  ;;  %s1507_s12 = scalar_lea.sflag [#allocation4], %s243_s15 }
  0x4c   : > { %s1196_s14 = scalar_lea.hbm %s1497_s9, 1024  ;;  %s1201_s24 = scalar_lea.hbm %s1627_s0, 4096 }
  0x4d   : > { %p1197_p0 = scmp.ne.s32.totalorder %s1497_s9, %s1196_s14  ;;  %p1198_p3 = pneg %p1501_p10 }
  0x4e   : > { %p1202_p9 = scmp.lt.u32.totalorder %s1497_s9, %s1627_s0  ;;  %p1203_p12 = scmp.lt.u32.totalorder %s1201_s24, %s1196_s14 }
  0x4f   : > { %p1199_p5 = pnand %p1198_p3, %p1197_p0  ;;  %p1205_p2 = scmp.lt.u32.totalorder %s1196_s14, %s1497_s9 }
  0x50   : > { %p1204_p1 = por %p1203_p12, %p1202_p9 }
  0x51   : > { %p1200_p7 = pneg %p1199_p5 }
  0x52   : > { %p1206_p4 = por %p1205_p2, %p1204_p1 }
  0x54   : > { %p1207_p6 = pnand %p1206_p4, %p1200_p7 }
  0x56   : > { %1210 = shalt.err (!%p1207_p6)
}
  0x57   : > { %s1211_s15 = scalar_lea.vmem %s1505_s11, 1024  ;;  %s1318_s10 = smov [#allocation3]  }
  0x58   : > { %p1212_p8 = scmp.ne.s32.totalorder %s1505_s11, %s1211_s15  ;;  %s1216_s16 = sshll.u32 %s1318_s10, 4  ;;  %s1217_s16 = int_to_ptr.vmem [resolvable:$false] %s1216_s16 }
  0x59   : > { %s1218_s7 = scalar_lea.vmem %s1217_s16, 2048  ;;  %p1219_p5 = scmp.lt.s32.totalorder %s1505_s11, %s1217_s16 }
  0x5a   : > { %p1214_p13 = pnand %p1212_p8, %p1198_p3  ;;  %p1220_p9 = scmp.lt.s32.totalorder %s1218_s7, %s1211_s15 }
  0x5c   : > { %p1215_p0 = pneg %p1214_p13  ;;  %p1221_p12 = por %p1220_p9, %p1219_p5 }
  0x5e   : > { %p1222_p1 = pnand %p1221_p12, %p1215_p0 }
  0x60   : > { %1225 = shalt.err (!%p1222_p1)
}
  0x61   : > { %s1647_s14 = smov 128   ;;  %p1648_p3 = scmp.ne.s32.totalorder %s1642_s30, 0 }
  0x62   : > { %1059 = dma.hbm_to_vmem [thread:$0]  (!%p1501_p10), %s1497_s9, 1024, %s1505_s11, %s1507_s12, %s1647_s14, %s1647_s14, %s1317_s6  }
  0x63   : > { %266 = sbr.rel (%p1648_p3) target bundleno = 620 (0x26c), region = 40  ;;  %s1541_s24 = sand.u32 (!%p1648_p3), 1, %s1296_s19  }
  0x64   : > { %s824_s27 = sshll.u32 (!%p1648_p3), %s1541_s24, 6  ;;  %s269_s15 = scalar_lea.sflag (!%p1648_p3), [#allocation4], %s1541_s24 }
  0x65   : > { %s1547_s25 = scalar_lea.vmem (!%p1648_p3), [#allocation3], %s824_s27  ;;  %p1649_p7 = scmp.ne.s32.totalorder (!%p1648_p3), %s1640_s28, 0 }
  0x6a   : > { %1279 = dma.done.wait (%p1649_p7), %s269_s15, 1024  }
  0x6b   : > { %1281 = vsyncadd (%p1649_p7), %s269_s15, 4294966272  ;;  %p1650_p10 = scmp.ne.s32.totalorder %s1638_s26, 0 }
  0x6d   : > { %1283 = dma.done.wait (%p1650_p10), [#allocation7], 4096  }
  0x6e   : > { %1285 = vsyncadd (%p1650_p10), [#allocation7], 4294963200  ;;  %v336_v0 = vld [vmem:[#allocation6] sm:$0xff]  ;;  %v337_v1 = vld [vmem:[#allocation6 + $0x8] sm:$0xff]  ;;  %s309_s9 = scalar_lea.vmem [#allocation9], %s824_s27  ;;  %s836_s12 = sshll.u32 %s1304_s21, 10 }
  0x6f   : > { %v338_v2 = vld [vmem:[#allocation6 + $0x10] sm:$0xff]  ;;  %v973_v3 = vpack.c.bf16 %v337_v1, %v336_v0  ;;  %v339_v4 = vld [vmem:[#allocation6 + $0x18] sm:$0xff]  ;;  %v340_v6 = vld [vmem:[#allocation6 + $0x20] sm:$0xff]  ;;  %s697_s11 = sshll.u32 %s309_s9, 4  ;;  %s1579_s7 = scalar_lea.hbm %s1632_s5, %s836_s12  ;;  %s1574_s11 = int_to_ptr.vmem [resolvable:$true] %s697_s11 }
  0x70   : > { %v977_v5 = vpack.c.bf16 %v339_v4, %v338_v2  ;;  %v341_v7 = vld [vmem:[#allocation6 + $0x28] sm:$0xff]  ;;  %v328_v9 = vld [vmem:[%s1547_s25] sm:$0xff]  ;;  %v342_v10 = vld [vmem:[#allocation6 + $0x30] sm:$0xff]  ;;  %s684_s14 = scalar_lea.sflag [#allocation5], %s1541_s24  ;;  %s1226_s21 = scalar_lea.vmem %s1574_s11, 1024 }
  0x71   : > { %974 = vmatprep.subr.bf16.mxu0 %v973_v3  ;;  %v981_v8 = vpack.c.bf16 %v341_v7, %v340_v6  ;;  %v343_v11 = vld [vmem:[#allocation6 + $0x38] sm:$0xff]  ;;  %917 = vmatprep.mubr.f32.mxu0 %v328_v9  ;;  %v512_v12 = vld [vmem:[#allocation8] sm:$0xff]  ;;  %v513_v13 = vld [vmem:[#allocation8 + $0x8] sm:$0xff]  ;;  %p1227_p2 = scmp.ne.s32.totalorder %s1574_s11, %s1226_s21  ;;  %s1319_s27 = smov [#allocation9]  }
  0x72   : > { %976 = vmatpush3.bf16.msra.mxu0 %v973_v3  ;;  %v514_v14 = vld [vmem:[#allocation8 + $0x10] sm:$0xff]  ;;  %v985_v15 = vpack.c.bf16 %v343_v11, %v342_v10  ;;  %v344_v16 = vld [vmem:[#allocation6 + $0x40] sm:$0xff]  ;;  %v1005_v17 = vpack.c.bf16 %v513_v13, %v512_v12  ;;  %v515_v18 = vld [vmem:[#allocation8 + $0x18] sm:$0xff]  ;;  %s1230_s15 = sshll.u32 %s1319_s27, 4  ;;  %s1231_s15 = int_to_ptr.vmem [resolvable:$false] %s1230_s15 }
  0x73   : > { %978 = vmatprep.subr.bf16.mxu0 %v977_v5  ;;  %v345_v19 = vld [vmem:[#allocation6 + $0x48] sm:$0xff]  ;;  %v1009_v20 = vpack.c.bf16 %v515_v18, %v514_v14  ;;  %v516_v21 = vld [vmem:[#allocation8 + $0x20] sm:$0xff]  ;;  %v346_v25 = vld [vmem:[#allocation6 + $0x50] sm:$0xff]  ;;  %p1228_p4 = pnand %p1227_p2, %p1483_p11  ;;  %p1233_p8 = scmp.lt.s32.totalorder %s1574_s11, %s1231_s15 }
  0x74   : > { %v517_v22 = vld [vmem:[#allocation8 + $0x28] sm:$0xff]  ;;  %1006 = vmatprep.subr.bf16.mxu1 %v1005_v17  ;;  %v989_v23 = vpack.c.bf16 %v345_v19, %v344_v16  ;;  %v347_v26 = vld [vmem:[#allocation6 + $0x58] sm:$0xff]  ;;  %v348_v28 = vld [vmem:[#allocation6 + $0x60] sm:$0xff] }
  0x75   : > { %1008 = vmatpush3.bf16.msra.mxu1 %v1005_v17  ;;  %v1013_v24 = vpack.c.bf16 %v517_v22, %v516_v21  ;;  %v993_v27 = vpack.c.bf16 %v347_v26, %v346_v25  ;;  %v349_v29 = vld [vmem:[#allocation6 + $0x68] sm:$0xff]  ;;  %v350_v31 = vld [vmem:[#allocation6 + $0x70] sm:$0xff]  ;;  %v351_v32 = vld [vmem:[#allocation6 + $0x78] sm:$0xff]  ;;  %p1229_p6 = pneg %p1228_p4 }
  0x76   : > { %980 = vmatpush3.bf16.msra.mxu0 %v977_v5  ;;  %1010 = vmatprep.subr.bf16.mxu1 %v1009_v20  ;;  %v997_v30 = vpack.c.bf16 %v349_v29, %v348_v28  ;;  %v1001_v33 = vpack.c.bf16 %v351_v32, %v350_v31  ;;  %v329_v34 = vld [vmem:[%s1547_s25 + $0x8] sm:$0xff]  ;;  %v330_v35 = vld [vmem:[%s1547_s25 + $0x10] sm:$0xff]  ;;  %v331_v36 = vld [vmem:[%s1547_s25 + $0x18] sm:$0xff] }
  0x77   : > { %982 = vmatprep.subr.bf16.mxu0 %v981_v8  ;;  %v332_v37 = vld [vmem:[%s1547_s25 + $0x20] sm:$0xff]  ;;  %v333_v38 = vld [vmem:[%s1547_s25 + $0x28] sm:$0xff]  ;;  %v334_v39 = vld [vmem:[%s1547_s25 + $0x30] sm:$0xff] }
  0x78   : > { %v335_v40 = vld [vmem:[%s1547_s25 + $0x38] sm:$0xff]  ;;  %v518_v41 = vld [vmem:[#allocation8 + $0x30] sm:$0xff]  ;;  %v520_v44 = vld [vmem:[#allocation8 + $0x40] sm:$0xff]  ;;  %s1232_s25 = scalar_lea.vmem %s1231_s15, 2048 }
  0x79   : > { %1012 = vmatpush3.bf16.msra.mxu1 %v1009_v20  ;;  %v519_v42 = vld [vmem:[#allocation8 + $0x38] sm:$0xff]  ;;  %v521_v45 = vld [vmem:[#allocation8 + $0x48] sm:$0xff]  ;;  %v522_v47 = vld [vmem:[#allocation8 + $0x50] sm:$0xff]  ;;  %p1234_p13 = scmp.lt.s32.totalorder %s1232_s25, %s1226_s21 }
  0x7a   : > { %984 = vmatpush3.bf16.msra.mxu0 %v981_v8  ;;  %1014 = vmatprep.subr.bf16.mxu1 %v1013_v24  ;;  %v1017_v43 = vpack.c.bf16 %v519_v42, %v518_v41  ;;  %v1021_v46 = vpack.c.bf16 %v521_v45, %v520_v44  ;;  %v523_v48 = vld [vmem:[#allocation8 + $0x58] sm:$0xff]  ;;  %v524_v50 = vld [vmem:[#allocation8 + $0x60] sm:$0xff]  ;;  %v525_v51 = vld [vmem:[#allocation8 + $0x68] sm:$0xff] }
  0x7b   : > { %986 = vmatprep.subr.bf16.mxu0 %v985_v15  ;;  %v1025_v49 = vpack.c.bf16 %v523_v48, %v522_v47  ;;  %v1029_v52 = vpack.c.bf16 %v525_v51, %v524_v50  ;;  %v526_v53 = vld [vmem:[#allocation8 + $0x70] sm:$0xff]  ;;  %v527_v54 = vld [vmem:[#allocation8 + $0x78] sm:$0xff]  ;;  %v828_v56 = vld [vmem:[%s1629_s2] ss:$0 sm:$0xff]  ;;  %p1235_p0 = por %p1234_p13, %p1233_p8 }
  0x7c   : > { %v1033_v55 = vpack.c.bf16 %v527_v54, %v526_v53 }
  0x7d   : > { %1016 = vmatpush3.bf16.msra.mxu1 %v1013_v24  ;;  %p1236_p5 = pnand %p1235_p0, %p1229_p6 }
  0x7e   : > { %988 = vmatpush3.bf16.msra.mxu0 %v985_v15  ;;  %1018 = vmatprep.subr.bf16.mxu1 %v1017_v43 }
  0x7f   : > { %990 = vmatprep.subr.bf16.mxu0 %v989_v23 }
  0x81   : > { %1020 = vmatpush3.bf16.msra.mxu1 %v1017_v43 }
  0x82   : > { %992 = vmatpush3.bf16.msra.mxu0 %v989_v23  ;;  %1022 = vmatprep.subr.bf16.mxu1 %v1021_v46 }
  0x83   : > { %994 = vmatprep.subr.bf16.mxu0 %v993_v27 }
  0x85   : > { %1024 = vmatpush3.bf16.msra.mxu1 %v1021_v46 }
  0x86   : > { %996 = vmatpush3.bf16.msra.mxu0 %v993_v27  ;;  %1026 = vmatprep.subr.bf16.mxu1 %v1025_v49 }
  0x87   : > { %998 = vmatprep.subr.bf16.mxu0 %v997_v30 }
  0x89   : > { %1028 = vmatpush3.bf16.msra.mxu1 %v1025_v49  ;;  %v829_v49 = vld [vmem:[%s1631_s4] ss:$0 sm:$0xff] }
  0x8a   : > { %1000 = vmatpush3.bf16.msra.mxu0 %v997_v30  ;;  %1030 = vmatprep.subr.bf16.mxu1 %v1029_v52 }
  0x8b   : > { %1002 = vmatprep.subr.bf16.mxu0 %v1001_v33 }
  0x8d   : > { %1032 = vmatpush3.bf16.msra.mxu1 %v1029_v52 }
  0x8e   : > { %1004 = vmatpush3.bf16.msra.mxu0 %v1001_v33  ;;  %1034 = vmatprep.subr.bf16.mxu1 %v1033_v55 }
  0x91   : > { %918 = vmatmul.mubr.f32.vlgmr.msra.gmra.mrb[0].mxu0 %v329_v34  ;;  %1036 = vmatpush3.bf16.msra.mxu1 %v1033_v55 }
  0x92   : > { %920 = vmatprep.mubr.f32.mxu0 %v330_v35 }
  0x95   : > { %921 = vmatmul.mubr.f32.gmra.mrb[2].mxu0 %v331_v36 }
  0x96   : > { %923 = vmatprep.mubr.f32.mxu0 %v332_v37 }
  0x99   : > { %924 = vmatmul.mubr.f32.gmra.mrb[4].mxu0 %v333_v38 }
  0x9a   : > { %926 = vmatprep.mubr.f32.mxu0 %v334_v39 }
  0x9d   : > { %927 = vmatmul.mubr.f32.gmra.mrb[6].mxu0 %v335_v40 }
 0x164   : > { %v919_v57 = vpop.f32.mrb[0].mxu0 }
 0x165   : > { %v431_v58 = vadd.f32 %v919_v57, %v828_v56  ;;  %v425_v59 = vpop.f32.mrb[1].mxu0 }
 0x166   : > { %v426_v60 = vadd.f32 %v828_v56, %v425_v59 }
 0x167   : > { %v473_v61 = vmul.f32 0.70710677, %v431_v58  ;;  %v465_v22 = vmul.f32 0.5, %v431_v58 }
 0x168   : > { %v472_v62 = vmul.f32 0.70710677, %v426_v60  ;;  %v922_v63 = vpop.f32.mrb[2].mxu0  ;;  %v464_v20 = vmul.f32 0.5, %v426_v60 }
 0x169   : > { %1124 = verf.f32 %v473_v61  ;;  %v441_v0 = vadd.f32 %v922_v63, %v828_v56  ;;  %v435_v1 = vpop.f32.mrb[3].mxu0 }
 0x16a   : > { %1126 = verf.f32 %v472_v62  ;;  %v436_v2 = vadd.f32 %v828_v56, %v435_v1 }
 0x16b   : > { %v475_v3 = vmul.f32 0.70710677, %v441_v0  ;;  %v467_v30 = vmul.f32 0.5, %v441_v0 }
 0x16c   : > { %v474_v4 = vmul.f32 0.70710677, %v436_v2  ;;  %v925_v5 = vpop.f32.mrb[4].mxu0  ;;  %v466_v28 = vmul.f32 0.5, %v436_v2 }
 0x16d   : > { %1128 = verf.f32 %v475_v3  ;;  %v451_v6 = vadd.f32 %v925_v5, %v828_v56  ;;  %v445_v7 = vpop.f32.mrb[5].mxu0 }
 0x16e   : > { %1130 = verf.f32 %v474_v4  ;;  %v446_v8 = vadd.f32 %v828_v56, %v445_v7 }
 0x16f   : > { %v477_v9 = vmul.f32 0.70710677, %v451_v6  ;;  %v469_v38 = vmul.f32 0.5, %v451_v6 }
 0x170   : > { %v476_v10 = vmul.f32 0.70710677, %v446_v8  ;;  %v928_v11 = vpop.f32.mrb[6].mxu0  ;;  %v468_v36 = vmul.f32 0.5, %v446_v8 }
 0x171   : > { %1132 = verf.f32 %v477_v9  ;;  %v461_v12 = vadd.f32 %v928_v11, %v828_v56  ;;  %v455_v13 = vpop.f32.mrb[7].mxu0 }
 0x172   : > { %1134 = verf.f32 %v476_v10  ;;  %v456_v14 = vadd.f32 %v828_v56, %v455_v13 }
 0x173   : > { %v1125_v15 = vpop.eup %1124  ;;  %v479_v16 = vmul.f32 0.70710677, %v461_v12  ;;  %v471_v46 = vmul.f32 0.5, %v461_v12 }
 0x174   : > { %v1127_v17 = vpop.eup %1126  ;;  %v489_v18 = vadd.f32 1.0, %v1125_v15  ;;  %v478_v19 = vmul.f32 0.70710677, %v456_v14  ;;  %v470_v44 = vmul.f32 0.5, %v456_v14 }
 0x175   : > { %1136 = verf.f32 %v479_v16  ;;  %v488_v21 = vadd.f32 1.0, %v1127_v17 }
 0x176   : > { %1138 = verf.f32 %v478_v19  ;;  %v497_v27 = vmul.f32 %v489_v18, %v465_v22 }
 0x177   : > { %v1129_v23 = vpop.eup %1128  ;;  %v496_v24 = vmul.f32 %v488_v21, %v464_v20 }
 0x178   : > { %v1131_v25 = vpop.eup %1130  ;;  %v491_v26 = vadd.f32 1.0, %v1129_v23 }
 0x179   : > { %v490_v29 = vadd.f32 1.0, %v1131_v25  ;;  %961 = vmatprep.mubr.f32.mxu1 %v496_v24 }
 0x17a   : > { %962 = vmatmul.mubr.f32.vlgmr.msra.gmra.mrb[0].mxu1 %v497_v27  ;;  %v499_v35 = vmul.f32 %v491_v26, %v467_v30 }
 0x17b   : > { %v1133_v31 = vpop.eup %1132  ;;  %v498_v32 = vmul.f32 %v490_v29, %v466_v28 }
 0x17c   : > { %v1135_v33 = vpop.eup %1134  ;;  %v493_v34 = vadd.f32 1.0, %v1133_v31 }
 0x17d   : > { %v492_v37 = vadd.f32 1.0, %v1135_v33  ;;  %964 = vmatprep.mubr.f32.mxu1 %v498_v32 }
 0x17e   : > { %965 = vmatmul.mubr.f32.gmra.mrb[2].mxu1 %v499_v35  ;;  %v501_v43 = vmul.f32 %v493_v34, %v469_v38 }
 0x17f   : > { %v1137_v39 = vpop.eup %1136  ;;  %v500_v40 = vmul.f32 %v492_v37, %v468_v36 }
 0x180   : > { %v1139_v41 = vpop.eup %1138  ;;  %v495_v42 = vadd.f32 1.0, %v1137_v39 }
 0x181   : > { %v494_v45 = vadd.f32 1.0, %v1139_v41  ;;  %967 = vmatprep.mubr.f32.mxu1 %v500_v40 }
 0x182   : > { %968 = vmatmul.mubr.f32.gmra.mrb[4].mxu1 %v501_v43  ;;  %v503_v48 = vmul.f32 %v495_v42, %v471_v46 }
 0x183   : > { %v502_v47 = vmul.f32 %v494_v45, %v470_v44 }
 0x185   : > { %970 = vmatprep.mubr.f32.mxu1 %v502_v47 }
 0x186   : > { %971 = vmatmul.mubr.f32.gmra.mrb[6].mxu1 %v503_v48 }
 0x24d   : > { %v963_v50 = vpop.f32.mrb[0].mxu1 }
 0x24e   : > { %v668_v51 = vadd.f32 %v963_v50, %v829_v49  ;;  %v594_v52 = vpop.f32.mrb[1].mxu1 }
 0x24f   : > { %v667_v53 = vadd.f32 %v829_v49, %v594_v52 }
 0x250   : > { %676 = vst [vmem:[%s309_s9 + $0x8] sm:$0xff] %v668_v51 }
 0x251   : > { %675 = vst [vmem:[%s309_s9] sm:$0xff] %v667_v53  ;;  %v966_v54 = vpop.f32.mrb[2].mxu1 }
 0x252   : > { %v670_v55 = vadd.f32 %v966_v54, %v829_v49  ;;  %v604_v56 = vpop.f32.mrb[3].mxu1 }
 0x253   : > { %v669_v57 = vadd.f32 %v829_v49, %v604_v56 }
 0x254   : > { %678 = vst [vmem:[%s309_s9 + $0x18] sm:$0xff] %v670_v55 }
 0x255   : > { %677 = vst [vmem:[%s309_s9 + $0x10] sm:$0xff] %v669_v57  ;;  %v969_v58 = vpop.f32.mrb[4].mxu1 }
 0x256   : > { %v672_v59 = vadd.f32 %v969_v58, %v829_v49  ;;  %v614_v60 = vpop.f32.mrb[5].mxu1 }
 0x257   : > { %v671_v61 = vadd.f32 %v829_v49, %v614_v60 }
 0x258   : > { %680 = vst [vmem:[%s309_s9 + $0x28] sm:$0xff] %v672_v59 }
 0x259   : > { %679 = vst [vmem:[%s309_s9 + $0x20] sm:$0xff] %v671_v61  ;;  %v972_v62 = vpop.f32.mrb[6].mxu1 }
 0x25a   : > { %v674_v63 = vadd.f32 %v972_v62, %v829_v49  ;;  %v624_v0 = vpop.f32.mrb[7].mxu1 }
 0x25b   : > { %v673_v1 = vadd.f32 %v829_v49, %v624_v0 }
 0x25c   : > { %682 = vst [vmem:[%s309_s9 + $0x38] sm:$0xff] %v674_v63 }
 0x25d   : > { %681 = vst [vmem:[%s309_s9 + $0x30] sm:$0xff] %v673_v1 }
 0x25e   : > { %1239 = shalt.err (!%p1236_p5)
}
 0x25f   : > { %s1240_s26 = scalar_lea.hbm %s1579_s7, 1024  ;;  %s1244_s6 = scalar_lea.hbm %s1632_s5, 4096 }
 0x260   : > { %p1241_p9 = scmp.ne.s32.totalorder %s1579_s7, %s1240_s26  ;;  %p1245_p3 = scmp.lt.u32.totalorder %s1579_s7, %s1632_s5 }
 0x261   : > { %p1246_p7 = scmp.lt.u32.totalorder %s1244_s6, %s1240_s26  ;;  %p1248_p2 = scmp.lt.u32.totalorder %s1240_s26, %s1579_s7 }
 0x262   : > { %p1242_p12 = pnand %p1241_p9, %p1483_p11 }
 0x263   : > { %p1247_p10 = por %p1246_p7, %p1245_p3 }
 0x264   : > { %p1243_p1 = pneg %p1242_p12 }
 0x265   : > { %p1249_p4 = por %p1248_p2, %p1247_p10 }
 0x267   : > { %p1250_p6 = pnand %p1249_p4, %p1243_p1 }
 0x269   : > { %1253 = shalt.err (!%p1250_p6)
}
 0x26a   : > { %s1320_s10 = smov 128   ;;  %s1321_s16 = smov 8  }
 0x26b   : > { %1047 = dma.vmem_to_hbm [thread:$0]  (%p1483_p11), %s1574_s11, 1024, %s1579_s7, %s684_s14, %s1320_s10, %s1320_s10, %s1321_s16  }
 0x26c PF: > { %p1069_p8 = scmp.ge.s32.totalorder %s1312_s23, 2  ;;  %s712_s21 = sand.u32 1, %s1292_s18  }
 0x26d   : > { %p1651_p13 = scmp.ne.s32.totalorder %s1641_s29, 0  ;;  %s713_s27 = scalar_lea.sflag [#allocation5], %s712_s21 }
 0x26f   : > { %p1061_p0 = pnand %p1069_p8, %p1651_p13 }
 0x271   : > { %1287 = dma.done.wait (!%p1061_p0), %s713_s27, 1024  }
 0x272   : > { %1289 = vsyncadd (!%p1061_p0), %s713_s27, 4294966272  ;;  %s22_s23 = sadd.s32 1, %s1312_s23   ;;  %s1652_s18 = smov %s1296_s19 }
 0x273   : > { %p19_p5 = scmp.ge.s32.totalorder %s22_s23, 6   ;;  %s1653_s19 = smov %s1300_s20 }
 0x274   : > { %s1654_s20 = smov %s1492_s17  ;;  %s1655_s21 = smov %s1308_s22 }
 0x275   : > { %s1656_s22 = smov %s1658_s8  ;;  %21 = sbr.rel (!%p19_p5) target bundleno = 7 (0x7), region = 106 }
 0x27c   :  { %718 = vsyncpa [#allocation4], 1 }
 0x27d   :  { %720 = vsyncpa [#allocation4 + $0x1], 1 }
 0x27e   :  { %721 = vsyncpa [#allocation7], 1 }
 0x27f   :  { %722 = vsyncpa [#allocation5], 1 }
 0x280   :  { %724 = vsyncpa [#allocation5 + $0x1], 1 }

</bundles_post_ra>
